<compile_context>
chip_gen: v6e
topology: v6e:2x2x1
jax: 0.10.0
libtpu: 0.0.40
codegen_flags: <defaults>
</compile_context>

<pallas_src>
import functools

import jax
import jax.numpy as jnp
from jax.experimental import pallas as pl
from jax.experimental.pallas import tpu as pltpu


# ----------------------------------------------------------------------------
# Interpolation weight matrices
# ----------------------------------------------------------------------------
def _resize_matrix(out_size: int, in_size: int, mode: str) -> jnp.ndarray:
    """1-D interpolation matrix of shape (out_size, in_size), f32."""
    o = jnp.arange(out_size, dtype=jnp.float32)
    if mode == "bilinear":
        # half-pixel centers, PyTorch align_corners=False
        src = (o + 0.5) * (in_size / out_size) - 0.5
        src = jnp.clip(src, 0.0, in_size - 1.0)
        i0 = jnp.floor(src).astype(jnp.int32)
        i1 = jnp.minimum(i0 + 1, in_size - 1)
        w1 = src - i0.astype(jnp.float32)
        w0 = 1.0 - w1
        m = jnp.zeros((out_size, in_size), dtype=jnp.float32)
        m = m.at[jnp.arange(out_size), i0].add(w0)
        m = m.at[jnp.arange(out_size), i1].add(w1)
        return m
    elif mode == "nearest":
        # PyTorch default 'nearest': src = floor(dst * in/out)
        i0 = jnp.floor(o * (in_size / out_size)).astype(jnp.int32)
        i0 = jnp.clip(i0, 0, in_size - 1)
        m = jnp.zeros((out_size, in_size), dtype=jnp.float32)
        m = m.at[jnp.arange(out_size), i0].set(1.0)
        return m
    raise NotImplementedError(f"mode={mode!r}")  # TODO(synk): bicubic etc.


# ----------------------------------------------------------------------------
# VMEM budgeting (generation- and padding-aware)
# ----------------------------------------------------------------------------
def _round_up(v: int, m: int) -> int:
    return (v + m - 1) // m * m


def _padded_tile_bytes(h: int, w: int, dtype) -> int:
    """Physical VMEM bytes of one (h, w) tile: sublane x 128-lane padded."""
    itemsize = jnp.dtype(dtype).itemsize
    sublane = max(1, (8 * 4) // itemsize)      # 8 (f32), 16 (bf16), 32 (i8)
    return _round_up(max(h, 1), sublane) * _round_up(max(w, 1), 128) * itemsize


def _vmem_capacity_bytes() -> int:
    try:
        return int(pltpu.get_tpu_info().vmem_capacity_bytes)
    except Exception:
        return 64 * 1024 * 1024                # conservative (v7x-sized)


def _choose_c_blk(nc: int, h_in: int, w_in: int, h_out: int, w_out: int,
                  x_dtype, has_lateral: bool, data_budget: int) -> int:
    """Channel-block size from a physically-padded VMEM budget."""
    f32 = jnp.float32
    # Pipelined (double-buffered) HBM<->VMEM blocks, in the I/O dtype.
    per_plane = 2 * _padded_tile_bytes(h_in, w_in, x_dtype)
    per_plane += 2 * _padded_tile_bytes(h_out, w_out, x_dtype)
    if has_lateral:
        per_plane += 2 * _padded_tile_bytes(h_out, w_out, x_dtype)
    # f32 in-kernel temporaries (conservatively assumed all live at once).
    per_plane += _padded_tile_bytes(h_in, w_in, f32)       # x upcast
    per_plane += _padded_tile_bytes(w_in, h_in, f32)       # x^T
    per_plane += _padded_tile_bytes(w_in, h_out, f32)      # height-pass result
    per_plane += _padded_tile_bytes(h_out, w_in, f32)      # (height-pass)^T
    per_plane += _padded_tile_bytes(h_out, w_out, f32)     # width-pass result
    # Grid-invariant weights (count their double buffers once).
    fixed = 2 * (_padded_tile_bytes(h_in, h_out, f32)
                 + _padded_tile_bytes(w_in, w_out, f32))
    avail = max(data_budget - fixed, per_plane)
    c_blk = max(1, avail // per_plane)
    c_blk = int(min(c_blk, nc))
    if nc >= 2:
        # Keep >= 2 grid steps so both v7x TensorCores get work ("parallel").
        c_blk = min(c_blk, -(-nc // 2))
    return max(1, int(c_blk))


# ----------------------------------------------------------------------------
# Kernel
# ----------------------------------------------------------------------------
def _interp_kernel(x_ref, wht_ref, wwt_ref, *rest, add_lateral: bool):
    # x_ref:   (C_BLK, H_in, W_in)
    # wht_ref: (H_in, W/H? no:) (H_in, H_out)   grid-invariant (= Wh^T)
    # wwt_ref: (W_in, W_out)                    grid-invariant (= Ww^T)
    # [lat_ref: (C_BLK, H_out, W_out)]          optional fused lateral add
    # o_ref:   (C_BLK, H_out, W_out)
    if add_lateral:
        lat_ref, o_ref = rest
    else:
        (o_ref,) = rest
        lat_ref = None

    c_blk, h_in, w_in = x_ref.shape
    _, h_out, w_out = o_ref.shape

    x = x_ref[...].astype(jnp.float32)                          # (C, H_in, W_in)

    # Height pass: XLU minor-dims transpose, then ONE big-M MXU matmul
    # (M = C_BLK*W_in) — no broadcast Wh, no per-channel tiny matmuls.
    xt = pltpu.einshape("chw->cwh", x)                          # (C, W_in, H_in)
    y = jnp.dot(xt.reshape(c_blk * w_in, h_in), wht_ref[...],
                preferred_element_type=jnp.float32)             # (C*W_in, H_out)

    # Width pass: transpose back so W lands on lanes, second big-M matmul
    # (M = C_BLK*H_out); result is already in (C, H_out, W_out) layout.
    yt = pltpu.einshape("cwo->cow", y.reshape(c_blk, w_in, h_out))   # (C, H_out, W_in)
    out = jnp.dot(yt.reshape(c_blk * h_out, w_in), wwt_ref[...],
                  preferred_element_type=jnp.float32)           # (C*H_out, W_out)
    out = out.reshape(c_blk, h_out, w_out)

    if add_lateral:
        out = out + lat_ref[...].astype(jnp.float32)

    o_ref[...] = out.astype(o_ref.dtype)


# ----------------------------------------------------------------------------
# Wrapper
# ----------------------------------------------------------------------------
@functools.partial(jax.jit, static_argnames=("scale_factor", "mode"))
def interpolate(x: jnp.ndarray, scale_factor: int = 2, mode: str = "bilinear",
                lateral: jnp.ndarray | None = None):
    """Pallas equivalent of
         F.interpolate(x, scale_factor, mode, align_corners=False)  [+ lateral]
    x: (N, C, H, W).  If `lateral` is given (shape (N, C, H*sf, W*sf)), the
    FPN lateral add is fused into the kernel (one HBM read/write saved).
    """
    n, c, h_in, w_in = x.shape
    h_out = int(round(h_in * scale_factor))
    w_out = int(round(w_in * scale_factor))
    nc = n * c
    itemsize = jnp.dtype(x.dtype).itemsize
    has_lateral = lateral is not None
    if has_lateral:
        assert lateral.shape == (n, c, h_out, w_out), lateral.shape

    # Weights stay f32 (scale-2 weights are exact; all in-kernel math is f32).
    wht = _resize_matrix(h_out, h_in, mode).T                   # (H_in, H_out)
    wwt = _resize_matrix(w_out, w_in, mode).T                   # (W_in, W_out)

    # Generation-aware VMEM budgets.
    vmem_cap = _vmem_capacity_bytes()
    if vmem_cap >= 96 * 1024 * 1024:           # v5e / v6e: 128 MiB VMEM
        data_budget = 28 * 1024 * 1024
        vmem_limit = 96 * 1024 * 1024
    else:                                      # v7x: 64 MiB VMEM
        data_budget = 16 * 1024 * 1024
        vmem_limit = 44 * 1024 * 1024

    c_blk = _choose_c_blk(nc, h_in, w_in, h_out, w_out, x.dtype,
                          has_lateral, data_budget)
    grid = (pl.cdiv(nc, c_blk),)

    x_flat = x.reshape(nc, h_in, w_in)

    flops = 2 * nc * (w_in * h_in * h_out + h_out * w_in * w_out)
    bytes_accessed = (nc * (h_in * w_in + h_out * w_out) * itemsize
                      + (wht.size + wwt.size) * 4)
    if has_lateral:
        bytes_accessed += nc * h_out * w_out * jnp.dtype(lateral.dtype).itemsize
    cost = pl.CostEstimate(flops=int(flops), transcendentals=0,
                           bytes_accessed=int(bytes_accessed))

    in_specs = [
        pl.BlockSpec((c_blk, h_in, w_in), lambda i: (i, 0, 0)),
        pl.BlockSpec((h_in, h_out), lambda i: (0, 0)),
        pl.BlockSpec((w_in, w_out), lambda i: (0, 0)),
    ]
    operands = [x_flat, wht, wwt]
    if has_lateral:
        in_specs.append(pl.BlockSpec((c_blk, h_out, w_out), lambda i: (i, 0, 0)))
        operands.append(lateral.reshape(nc, h_out, w_out))

    out_flat = pl.pallas_call(
        functools.partial(_interp_kernel, add_lateral=has_lateral),
        out_shape=jax.ShapeDtypeStruct((nc, h_out, w_out), x.dtype),
        grid_spec=pltpu.PrefetchScalarGridSpec(
            num_scalar_prefetch=0,
            grid=grid,
            in_specs=in_specs,
            out_specs=pl.BlockSpec((c_blk, h_out, w_out), lambda i: (i, 0, 0)),
        ),
        compiler_params=pltpu.CompilerParams(
            dimension_semantics=("parallel",),
            vmem_limit_bytes=vmem_limit,
        ),
        cost_estimate=cost,
    )(*operands)

    return out_flat.reshape(n, c, h_out, w_out)


# ----------------------------------------------------------------------------
# Plain-JAX reference
# ----------------------------------------------------------------------------
def _reference_resize(x, scale_factor=2, mode="bilinear"):
    n, c, h_in, w_in = x.shape
    h_out, w_out = h_in * scale_factor, w_in * scale_factor
    wh = _resize_matrix(h_out, h_in, mode)
    ww = _resize_matrix(w_out, w_in, mode)
    return jnp.einsum("oh,nchw,pw->ncop", wh, x.astype(jnp.float32), ww
                      ).astype(x.dtype)


if __name__ == "__main__":
    key = jax.random.PRNGKey(0)
    x = jax.random.normal(key, (2, 4, 16, 16), dtype=jnp.float32)

    # 1) bilinear (the Interpolate module: align_corners=False)
    out = jax.block_until_ready(interpolate(x, scale_factor=2, mode="bilinear"))
    assert out.shape == (2, 4, 32, 32), out.shape
    ref = _reference_resize(x, 2, "bilinear")
    assert jnp.allclose(out, ref, atol=1e-5, rtol=1e-5), "bilinear mismatch"

    # 2) nearest + fused lateral add (the `P*_conv1(c) + F.interpolate(p, 2)`
    #    pattern inside FPN.forward)
    lat = jax.random.normal(jax.random.PRNGKey(2), (2, 4, 32, 32),
                            dtype=jnp.float32)
    out_f = jax.block_until_ready(
        interpolate(x, scale_factor=2, mode="nearest", lateral=lat))
    ref_f = jnp.repeat(jnp.repeat(x, 2, axis=2), 2, axis=3) + lat
    assert jnp.allclose(out_f, ref_f, atol=1e-5, rtol=1e-5), "fused add mismatch"

    # 3) nearest alone (the bare F.interpolate default)
    out_n = jax.block_until_ready(interpolate(x, scale_factor=2, mode="nearest"))
    ref_n = jnp.repeat(jnp.repeat(x, 2, axis=2), 2, axis=3)
    assert jnp.allclose(out_n, ref_n, atol=1e-5, rtol=1e-5), "nearest mismatch"

    # 4) non-divisible N*C (exercises grid padding) + different spatial size
    x2 = jax.random.normal(jax.random.PRNGKey(1), (1, 3, 8, 8), dtype=jnp.float32)
    out2 = jax.block_until_ready(interpolate(x2, scale_factor=2, mode="bilinear"))
    ref2 = _reference_resize(x2, 2, "bilinear")
    assert out2.shape == (1, 3, 16, 16), out2.shape
    assert jnp.allclose(out2, ref2, atol=1e-5, rtol=1e-5), "padded-block mismatch"

    # 5) bf16 input: internal math is f32, so only the final cast rounds
    xb = x.astype(jnp.bfloat16)
    outb = jax.block_until_ready(interpolate(xb, scale_factor=2, mode="bilinear"))
    refb = _reference_resize(xb, 2, "bilinear")
    assert jnp.allclose(outb.astype(jnp.float32), refb.astype(jnp.float32),
                        atol=5e-2, rtol=5e-2), "bf16 mismatch"

    print("KERNEL_OK")
</pallas_src>

<mosaic_0001>
module attributes {stable_mosaic.version = 11 : i64} {
  func.func private @main(%arg0: i32) attributes {dimension_semantics = [#tpu.dimension_semantics<core_parallel>], iteration_bounds = array<i64: 2>, tpu.core_type = #tpu.core_type<sc_scalar_subcore>, window_params = []} {
    return
  }
}

module attributes {stable_mosaic.version = 11 : i64} {
  func.func private @main(%arg0: i32) attributes {dimension_semantics = [#tpu.dimension_semantics<core_parallel>], iteration_bounds = array<i64: 2>, tpu.core_type = #tpu.core_type<sc_scalar_subcore>, window_params = []} {
    return
  }
}

module attributes {stable_mosaic.version = 11 : i64} {
  func.func @_interp_kernel(%arg0: i32, %arg1: memref<4x16x16xf32, #tpu.memory_space<vmem>>, %arg2: memref<16x32xf32, #tpu.memory_space<vmem>>, %arg3: memref<16x32xf32, #tpu.memory_space<vmem>>, %arg4: memref<4x32x32xf32, #tpu.memory_space<vmem>>) attributes {dimension_semantics = [#tpu.dimension_semantics<parallel>], iteration_bounds = array<i64: 2>, scalar_prefetch = 0 : i64, scratch_operands = 0 : i64, tpu.core_type = #tpu.core_type<tc>, window_params = [{transform_indices = @transform_0, window_bounds = array<i64: 4, 16, 16>}, {pipeline_mode = #tpu.pipeline_mode<synchronous>, transform_indices = @transform_1, window_bounds = array<i64: 16, 32>}, {pipeline_mode = #tpu.pipeline_mode<synchronous>, transform_indices = @transform_2, window_bounds = array<i64: 16, 32>}, {transform_indices = @transform_3, window_bounds = array<i64: 4, 32, 32>}]} {
    %c0 = arith.constant 0 : index
    %c0_0 = arith.constant 0 : index
    %c0_1 = arith.constant 0 : index
    %0 = vector.load %arg1[%c0, %c0_0, %c0_1] : memref<4x16x16xf32, #tpu.memory_space<vmem>>, vector<4x16x16xf32>
    %1 = tpu.transpose %0, [0, 2, 1] : vector<4x16x16xf32> -> vector<4x16x16xf32>
    %2 = vector.shape_cast %1 : vector<4x16x16xf32> to vector<64x16xf32>
    %c0_2 = arith.constant 0 : index
    %c0_3 = arith.constant 0 : index
    %3 = vector.load %arg2[%c0_2, %c0_3] : memref<16x32xf32, #tpu.memory_space<vmem>>, vector<16x32xf32>
    %cst = arith.constant dense<0.000000e+00> : vector<64x32xf32>
    %4 = tpu.matmul %2, %3, %cst {dimension_numbers = #tpu.dot_dimension_numbers<[1], [0], [0], [1], [0, 0, 1, 1], [], []>} : vector<64x16xf32>, vector<16x32xf32>, vector<64x32xf32> -> vector<64x32xf32>
    %5 = vector.shape_cast %4 : vector<64x32xf32> to vector<4x16x32xf32>
    %6 = tpu.transpose %5, [0, 2, 1] : vector<4x16x32xf32> -> vector<4x32x16xf32>
    %7 = vector.shape_cast %6 : vector<4x32x16xf32> to vector<128x16xf32>
    %c0_4 = arith.constant 0 : index
    %c0_5 = arith.constant 0 : index
    %8 = vector.load %arg3[%c0_4, %c0_5] : memref<16x32xf32, #tpu.memory_space<vmem>>, vector<16x32xf32>
    %cst_6 = arith.constant dense<0.000000e+00> : vector<128x32xf32>
    %9 = tpu.matmul %7, %8, %cst_6 {dimension_numbers = #tpu.dot_dimension_numbers<[1], [0], [0], [1], [0, 0, 1, 1], [], []>} : vector<128x16xf32>, vector<16x32xf32>, vector<128x32xf32> -> vector<128x32xf32>
    %10 = vector.shape_cast %9 : vector<128x32xf32> to vector<4x32x32xf32>
    %c0_7 = arith.constant 0 : index
    %c0_8 = arith.constant 0 : index
    %c0_9 = arith.constant 0 : index
    %11 = vector.load %arg4[%c0_7, %c0_8, %c0_9] : memref<4x32x32xf32, #tpu.memory_space<vmem>>, vector<4x32x32xf32>
    tpu.vector_store %arg4[%c0_7, %c0_8, %c0_9], %10 {strides = array<i32>} : memref<4x32x32xf32, #tpu.memory_space<vmem>>, vector<4x32x32xf32>,
    return
  }
  func.func @transform_0(%arg0: i32) -> (i32, i32, i32) {
    %c0_i32 = arith.constant 0 : i32
    %c0_i32_0 = arith.constant 0 : i32
    %c0_i32_1 = arith.constant 0 : i32
    return %arg0, %c0_i32, %c0_i32_0 : i32, i32, i32
  }
  func.func @transform_1(%arg0: i32) -> (i32, i32) {
    %c0_i32 = arith.constant 0 : i32
    %c0_i32_0 = arith.constant 0 : i32
    %c0_i32_1 = arith.constant 0 : i32
    return %c0_i32, %c0_i32_0 : i32, i32
  }
  func.func @transform_2(%arg0: i32) -> (i32, i32) {
    %c0_i32 = arith.constant 0 : i32
    %c0_i32_0 = arith.constant 0 : i32
    %c0_i32_1 = arith.constant 0 : i32
    return %c0_i32, %c0_i32_0 : i32, i32
  }
  func.func @transform_3(%arg0: i32) -> (i32, i32, i32) {
    %c0_i32 = arith.constant 0 : i32
    %c0_i32_0 = arith.constant 0 : i32
    %c0_i32_1 = arith.constant 0 : i32
    return %arg0, %c0_i32, %c0_i32_0 : i32, i32, i32
  }
}

</mosaic_0001>

<bundles_post_ra>
// kernel: interpolate.1
= control target key start
LH: loop header
LB: loop body
LE: loop exit
PB: predicated region body
PF: predicated region fallthrough
CT: control target
= control target key end

     0   :  { %8 = vsyncpa [#allocation3], 0  ;;  %s1452_s0 = inlined_call_operand.vmem [shape: f32[8,16,16], index: 0, kind: input, shape index: {}]   ;;  %s1453_s1 = inlined_call_operand.hbm [shape: f32[16,32], index: 1, kind: input, shape index: {}, may-alias: {1,2}]   ;;  %s1454_s2 = inlined_call_operand.hbm [shape: f32[16,32], index: 2, kind: input, shape index: {}, may-alias: {1,2}]   ;;  %s1455_s3 = inlined_call_operand.hbm [shape: f32[8,32,32], index: 3, kind: output, shape index: {}]  }
   0x1   :  { %9 = vsyncpa [#allocation6], 0 }
   0x2   :  { %10 = vsyncpa [#allocation4], 0 }
   0x3   :  { %12 = vsyncpa [#allocation4 + $0x1], 0  ;;  %s1247_s12 = smov 0   ;;  %s1249_s13 = smov 0  }
   0x4   :  { %s1251_s14 = smov 0   ;;  %s1253_s15 = smov 0  }
   0x5 LB: > { %s1268_s16 = sadd.s32 4294967295, %s1218_s15   ;;  %s912_s17 = sadd.s32 4294967294, %s1218_s15   ;;  %s1218_s15 = sphi %s1253_s15, %s1469_s15   ;;  %s1214_s14 = sphi %s1251_s14, %s1468_s14   ;;  %s1210_s13 = sphi %s1249_s13, %s1467_s13   ;;  %s1206_s12 = sphi %s1247_s12, %s1466_s12  }
   0x6   : > { %s1272_s18 = sadd.s32 1, %s1218_s15   ;;  %s93_s19 = sadd.s32 1, %s1214_s14 }
   0x7   : > { %s90_s20 = ssub.s32 %s1218_s15, %s1272_s18  ;;  %p103_p0 = scmp.ne.s32.totalorder %s1214_s14, %s1210_s13 }
   0x8   : > { %p91_p1 = scmp.eq.s32.totalorder %s90_s20, 0  ;;  %p104_p2 = scmp.eq.s32.totalorder %s1268_s16, 1 }
   0x9   : > { %p109_p3 = scmp.ne.s32.totalorder %s1210_s13, %s1206_s12  ;;  %p110_p4 = scmp.eq.s32.totalorder %s912_s17, 1 }
   0xa   : > { %s1283_s21 = scalar_select %p91_p1, %s1214_s14, %s93_s19  }
   0xb   : > { %p1285_p5 = por %p104_p2, %p103_p0  ;;  %p1289_p6 = por %p110_p4, %p109_p3 }
   0xc   : > { %p913_p7 = scmp.ge.s32.totalorder %s1218_s15, 1  ;;  %p117_p8 = scmp.lt.s32.totalorder %s1218_s15, 3 }
   0xd   : > { %s1458_s23 = scalar_select %p1289_p6, 1, 0 }
   0xe   : > { %p1456_p9 = scmp.eq.s32.totalorder %s1268_s16, 0  ;;  %p1296_p10 = pnand %p913_p7, %p117_p8 }
   0xf   : > { %s1220_s25 = smov [#allocation2]   ;;  %s1221_s28 = smov [#allocation5]  }
  0x10   : > { %s129_s26 = sshll.u32 %s1220_s25, 4  ;;  %p1043_p11 = pneg %p1296_p10  ;;  %s130_s26 = int_to_ptr.vmem [resolvable:$true] %s129_s26 }
  0x11   : > { %s142_s29 = sshll.u32 %s1221_s28, 4  ;;  %s1109_s30 = scalar_lea.vmem %s130_s26, 256  ;;  %s143_s29 = int_to_ptr.vmem [resolvable:$true] %s142_s29 }
  0x12   : > { %p1304_p12 = pnand %p1456_p9, %p1043_p11  ;;  %p1110_p0 = scmp.ne.s32.totalorder %s130_s26, %s1109_s30 }
  0x13   : > { %p1117_p3 = scmp.lt.s32.totalorder %s130_s26, %s130_s26  ;;  %p1118_p4 = scmp.lt.s32.totalorder %s1109_s30, %s1109_s30 }
  0x14   : > { %p1100_p13 = pneg %p1304_p12 }
  0x15   : > { %p1119_p7 = por %p1118_p4, %p1117_p3 }
  0x16   : > { %p1112_p1 = pnand %p1110_p0, %p1100_p13 }
  0x18   : > { %p1113_p2 = pneg %p1112_p1 }
  0x1a   : > { %p1120_p8 = pnand %p1119_p7, %p1113_p2 }
  0x1c   : > { %1123 = shalt.err (!%p1120_p8)
}
  0x1d   : > { %s1222_s4 = smov 128   ;;  %s1223_s5 = smov 8  }
  0x1e   : > { %1046 = dma.hbm_to_vmem [thread:$0]  (!%p1304_p12), %s1453_s1, 256, %s130_s26, [#allocation3], %s1222_s4, %s1222_s4, %s1223_s5  }
  0x1f   : > { %s1135_s8 = scalar_lea.vmem %s143_s29, 256  ;;  %p1143_p9 = scmp.lt.s32.totalorder %s143_s29, %s143_s29 }
  0x20   : > { %p1136_p11 = scmp.ne.s32.totalorder %s143_s29, %s1135_s8  ;;  %p1144_p6 = scmp.lt.s32.totalorder %s1135_s8, %s1135_s8 }
  0x22   : > { %p1138_p0 = pnand %p1136_p11, %p1100_p13  ;;  %p1145_p3 = por %p1144_p6, %p1143_p9 }
  0x24   : > { %p1139_p1 = pneg %p1138_p0 }
  0x26   : > { %p1146_p2 = pnand %p1145_p3, %p1139_p1 }
  0x28   : > { %1149 = shalt.err (!%p1146_p2)
}
  0x29   : > { %1049 = dma.hbm_to_vmem [thread:$0]  (!%p1304_p12), %s1454_s2, 256, %s143_s29, [#allocation6], %s1222_s4, %s1222_s4, %s1223_s5  }
  0x2a   : > { %168 = sbr.rel (%p1296_p10) target bundleno = 752 (0x2f0), region = 32  ;;  %p1461_p4 = scmp.eq.s32.totalorder (!%p1296_p10), %s1268_s16, 0 }
  0x2f   : > { %1193 = dma.done.wait (%p1461_p4), [#allocation3], 256   ;;  %p1462_p13 = pmov %p1461_p4 }
  0x30   : > { %p1463_p7 = pmov %p1461_p4 }
  0x31   : > { %1195 = vsyncadd (%p1462_p13), [#allocation3], 4294967040 }
  0x32   : > { %1197 = dma.done.wait (%p1463_p7), [#allocation6], 256   ;;  %p1464_p6 = pmov %p1461_p4 }
  0x33   : > { %s921_s11 = sshll.u32 %s1268_s16, 2  ;;  %v342_v4 = vld [vmem:[#allocation2 + $0x8] sm:$0xff]  ;;  %v341_v5 = vld [vmem:[#allocation2] sm:$0xff]  ;;  %vm343_vm0 = vcmask 130048   ;;  %v602_v20 = vld [vmem:[#allocation5 + $0x8] sm:$0xff]  ;;  %s194_s25 = sand.u32 1, %s1210_s13  }
  0x34   : > { %1199 = vsyncadd (%p1464_p6), [#allocation6], 4294967040  ;;  %p198_p9 = scmp.lt.s32.totalorder %s921_s11, 7  ;;  %985 = vmatprep.subr.mxu0 %v342_v4  ;;  %1029 = vmatprep.subr.mxu1 %v602_v20  ;;  %v601_v23 = vld [vmem:[#allocation5] sm:$0xff]  ;;  %s920_s26 = sshll.u32 %s194_s25, 7  ;;  %vm796_vm1 = vcmask 261120  }
  0x35   : > { %986 = vmatpush3.msra.mxu0 %v342_v4  ;;  %1031 = vmatpush3.msra.mxu1 %v602_v20  ;;  %s1367_s27 = scalar_lea.vmem [#allocation7], %s920_s26  ;;  %s956_s28 = sshll.u32 %s1268_s16, 11 }
  0x36   : > { %s1471_s11 = smov (!%p198_p9, %s921_s11), 7  ;;  %987 = vmatprep.subr.mxu0 %v341_v5  ;;  %1030 = vmatprep.subr.mxu1 %v601_v23  ;;  %s828_s29 = sshll.u32 %s1367_s27, 4  ;;  %s1404_s29 = int_to_ptr.vmem [resolvable:$true] %s828_s29 }
  0x37   : > { %s954_s17 = sshll.u32 %s1471_s11, 4  ;;  %988 = vmatpush3.msra.mxu0 %v341_v5  ;;  %1032 = vmatpush3.msra.mxu1 %v601_v23  ;;  %s1402_s5 = scalar_lea.hbm %s1455_s3, %s956_s28 }
  0x38   : > { %s202_s24 = scalar_lea.vmem %s1452_s0, %s954_s17  ;;  %1001 = vmatprep.subr.mxu0 %v602_v20  ;;  %s1412_s16 = scalar_lea.sflag [#allocation4], %s194_s25 }
  0x39   : > { %v205_v0 = vld [vmem:[%s202_s24] sm:$0xff]  ;;  %v207_v1 = vld [vmem:[%s202_s24 + $0x10] sm:$0xff]  ;;  %v206_v2 = vld [vmem:[%s202_s24 + $0x8] sm:$0xff]  ;;  %s1150_s6 = scalar_lea.vmem %s1404_s29, 2048  ;;  %s1224_s7 = smov [#allocation7]  }
  0x3a   : > { %213 = vxpose.xlu0.b32.start [1/2] (short) (narrow) %v205_v0, 16  ;;  %245 = vxpose.xlu1.b32.start [1/2] (short) (narrow) %v207_v1, 16  ;;  %v208_v3 = vld [vmem:[%s202_s24 + $0x18] sm:$0xff]  ;;  %v209_v6 = vld [vmem:[%s202_s24 + $0x20] sm:$0xff]  ;;  %v211_v7 = vld [vmem:[%s202_s24 + $0x30] sm:$0xff]  ;;  %p1151_p10 = scmp.ne.s32.totalorder %s1404_s29, %s1150_s6  ;;  %s1154_s8 = sshll.u32 %s1224_s7, 4  ;;  %s1155_s8 = int_to_ptr.vmem [resolvable:$false] %s1154_s8 }
  0x3b   : > { %v210_v8 = vld [vmem:[%s202_s24 + $0x28] sm:$0xff]  ;;  %v212_v9 = vld [vmem:[%s202_s24 + $0x38] sm:$0xff]  ;;  %s1156_s9 = scalar_lea.vmem %s1155_s8, 4096  ;;  %p1157_p11 = scmp.lt.s32.totalorder %s1404_s29, %s1155_s8 }
  0x3c   : > { %p1152_p12 = pnand %p1151_p10, %p1285_p5  ;;  %p1158_p0 = scmp.lt.s32.totalorder %s1156_s9, %s1150_s6 }
  0x3e   : > { %214 = vxpose.xlu0.b32.end [2/2] (short) (narrow) %v206_v2, 16  ;;  %246 = vxpose.xlu1.b32.end [2/2] (short) (narrow) %v208_v3, 16  ;;  %p1153_p8 = pneg %p1152_p12  ;;  %p1159_p1 = por %p1158_p0, %p1157_p11 }
  0x40   : > { %p1160_p3 = pnand %p1159_p1, %p1153_p8 }
  0x42   : > { %277 = vxpose.xlu0.b32.start [1/2] (short) (narrow) %v209_v6, 16  ;;  %309 = vxpose.xlu1.b32.start [1/2] (short) (narrow) %v211_v7, 16 }
  0x46   : > { %278 = vxpose.xlu0.b32.end [2/2] (short) (narrow) %v210_v8, 16  ;;  %310 = vxpose.xlu1.b32.end [2/2] (short) (narrow) %v212_v9, 16 }
  0xb6   : > { %v229_v10 = vpop.trf.xlu0  ;;  %v261_v11 = vpop.trf.xlu1 }
  0xb7   : > { %989 = vmatprep.mubr.msk.f32.mxu0 %vm343_vm0, %v229_v10 }
  0xba   : > { %v230_v12 = vpop.trf.xlu0  ;;  %v262_v13 = vpop.trf.xlu1 }
  0xbb   : > { %990 = vmatmul.mubr.msk.f32.vlgmr.msra.gmra.mxu0 %vm343_vm0, %v230_v12 }
  0xbc   : > { %992 = vmatprep.mubr.msk.f32.mxu0 %vm343_vm0, %v261_v11  ;;  %1002 = vmatpush3.msra.mxu0 %v602_v20 }
  0xbd   : > { %1003 = vmatprep.subr.mxu0 %v601_v23 }
  0xbe   : > { %v293_v14 = vpop.trf.xlu0  ;;  %v325_v15 = vpop.trf.xlu1  ;;  %1004 = vmatpush3.msra.mxu0 %v601_v23 }
  0xbf   : > { %993 = vmatmul.mubr.msk.f32.gmra.mxu0 %vm343_vm0, %v262_v13 }
  0xc0   : > { %995 = vmatprep.mubr.msk.f32.mxu0 %vm343_vm0, %v293_v14 }
  0xc2   : > { %v294_v16 = vpop.trf.xlu0  ;;  %v326_v17 = vpop.trf.xlu1 }
  0xc3   : > { %996 = vmatmul.mubr.msk.f32.gmra.mxu0 %vm343_vm0, %v294_v16 }
  0xc4   : > { %998 = vmatprep.mubr.msk.f32.mxu0 %vm343_vm0, %v325_v15 }
  0xc7   : > { %999 = vmatmul.mubr.msk.f32.gmra.mxu0 %vm343_vm0, %v326_v17 }
 0x17b   : > { %v991_v18 = vpop.f32.mrf.mxu0 }
 0x17d   : > { %v434_v19 = vpop.f32.mrf.mxu0 }
 0x17f   : > { %v994_v21 = vpop.f32.mrf.mxu0 }
 0x181   : > { %v444_v22 = vpop.f32.mrf.mxu0 }
 0x182   : > { %505 = vxpose.xlu0.b32.start [1/2] (short) (narrow) %v444_v22, 32 }
 0x183   : > { %v997_v24 = vpop.f32.mrf.mxu0 }
 0x185   : > { %v454_v25 = vpop.f32.mrf.mxu0 }
 0x186   : > { %506 = vxpose.xlu0.b32.end [2/2] (short) (narrow) %v994_v21, 32  ;;  %537 = vxpose.xlu1.b32.start [1/2] (short) (narrow) %v454_v25, 32 }
 0x187   : > { %v1000_v26 = vpop.f32.mrf.mxu0 }
 0x189   : > { %v464_v27 = vpop.f32.mrf.mxu0 }
 0x18a   : > { %538 = vxpose.xlu1.b32.end [2/2] (short) (narrow) %v997_v24, 32 }
 0x18f   : > { %473 = vxpose.xlu0.b32.start [1/2] (short) (narrow) %v434_v19, 32 }
 0x193   : > { %474 = vxpose.xlu0.b32.end [2/2] (short) (narrow) %v991_v18, 32  ;;  %569 = vxpose.xlu1.b32.start [1/2] (short) (narrow) %v464_v27, 32 }
 0x197   : > { %570 = vxpose.xlu1.b32.end [2/2] (short) (narrow) %v1000_v26, 32 }
 0x1fe   : > { %v521_v28 = vpop.trf.xlu0 }
 0x1ff   : > { %1011 = vmatprep.mubr.msk.f32.mxu1 %vm343_vm0, %v521_v28 }
 0x202   : > { %v553_v29 = vpop.trf.xlu1  ;;  %v522_v30 = vpop.trf.xlu0 }
 0x203   : > { %1012 = vmatmul.mubr.msk.f32.vlgmr.msra.gmra.mxu1 %vm343_vm0, %v522_v30 }
 0x206   : > { %v554_v31 = vpop.trf.xlu1  ;;  %v523_v32 = vpop.trf.xlu0 }
 0x207   : > { %1014 = vmatprep.mubr.msk.f32.mxu1 %vm343_vm0, %v523_v32 }
 0x20a   : > { %v555_v33 = vpop.trf.xlu1  ;;  %v524_v34 = vpop.trf.xlu0 }
 0x20b   : > { %1015 = vmatmul.mubr.msk.f32.gmra.mxu1 %vm343_vm0, %v524_v34 }
 0x20c   : > { %1017 = vmatprep.mubr.msk.f32.mxu1 %vm343_vm0, %v553_v29 }
 0x20e   : > { %v556_v35 = vpop.trf.xlu1  ;;  %v489_v36 = vpop.trf.xlu0 }
 0x20f   : > { %1018 = vmatmul.mubr.msk.f32.gmra.mxu1 %vm343_vm0, %v554_v31  ;;  %1005 = vmatprep.mubr.msk.f32.mxu0 %vm343_vm0, %v489_v36 }
 0x210   : > { %1020 = vmatprep.mubr.msk.f32.mxu1 %vm343_vm0, %v555_v33 }
 0x212   : > { %v585_v37 = vpop.trf.xlu1  ;;  %v490_v38 = vpop.trf.xlu0 }
 0x213   : > { %1021 = vmatmul.mubr.msk.f32.gmra.mxu1 %vm343_vm0, %v556_v35  ;;  %1006 = vmatmul.mubr.msk.f32.vlgmr.msra.gmra.mxu0 %vm343_vm0, %v490_v38 }
 0x214   : > { %1023 = vmatprep.mubr.msk.f32.mxu1 %vm343_vm0, %v585_v37 }
 0x216   : > { %v586_v39 = vpop.trf.xlu1  ;;  %v491_v40 = vpop.trf.xlu0 }
 0x217   : > { %1024 = vmatmul.mubr.msk.f32.gmra.mxu1 %vm343_vm0, %v586_v39  ;;  %1008 = vmatprep.mubr.msk.f32.mxu0 %vm343_vm0, %v491_v40 }
 0x21a   : > { %v587_v41 = vpop.trf.xlu1  ;;  %v492_v42 = vpop.trf.xlu0 }
 0x21b   : > { %1026 = vmatprep.mubr.msk.f32.mxu1 %vm343_vm0, %v587_v41  ;;  %1009 = vmatmul.mubr.msk.f32.gmra.mxu0 %vm343_vm0, %v492_v42 }
 0x21e   : > { %v588_v43 = vpop.trf.xlu1 }
 0x21f   : > { %1027 = vmatmul.mubr.msk.f32.gmra.mxu1 %vm343_vm0, %v588_v43 }
 0x2c3   : > { %v1013_v44 = vpop.f32.mrf.mxu1 }
 0x2c4   : > { %802 = vst.msk [vmem:[%s1367_s27 + $0x28] sm:$0xff] %vm796_vm1, %v1013_v44 }
 0x2c5   : > { %v737_v45 = vpop.f32.mrf.mxu1 }
 0x2c6   : > { %801 = vst.msk [vmem:[%s1367_s27 + $0x20] sm:$0xff] %vm796_vm1, %v737_v45 }
 0x2cb   : > { %v1016_v46 = vpop.f32.mrf.mxu1 }
 0x2cc   : > { %804 = vst.msk [vmem:[%s1367_s27 + $0x38] sm:$0xff] %vm796_vm1, %v1016_v46 }
 0x2cd   : > { %v747_v47 = vpop.f32.mrf.mxu1 }
 0x2ce   : > { %803 = vst.msk [vmem:[%s1367_s27 + $0x30] sm:$0xff] %vm796_vm1, %v747_v47 }
 0x2cf   : > { %v1019_v48 = vpop.f32.mrf.mxu1 }
 0x2d0   : > { %806 = vst.msk [vmem:[%s1367_s27 + $0x48] sm:$0xff] %vm796_vm1, %v1019_v48 }
 0x2d1   : > { %v757_v49 = vpop.f32.mrf.mxu1 }
 0x2d2   : > { %805 = vst.msk [vmem:[%s1367_s27 + $0x40] sm:$0xff] %vm796_vm1, %v757_v49 }
 0x2d3   : > { %v1022_v50 = vpop.f32.mrf.mxu1  ;;  %v1007_v51 = vpop.f32.mrf.mxu0 }
 0x2d4   : > { %808 = vst.msk [vmem:[%s1367_s27 + $0x58] sm:$0xff] %vm796_vm1, %v1022_v50  ;;  %798 = vst.msk [vmem:[%s1367_s27 + $0x8] sm:$0xff] %vm796_vm1, %v1007_v51 }
 0x2d5   : > { %v767_v52 = vpop.f32.mrf.mxu1  ;;  %v717_v53 = vpop.f32.mrf.mxu0 }
 0x2d6   : > { %807 = vst.msk [vmem:[%s1367_s27 + $0x50] sm:$0xff] %vm796_vm1, %v767_v52  ;;  %797 = vst.msk [vmem:[%s1367_s27] sm:$0xff] %vm796_vm1, %v717_v53 }
 0x2d7   : > { %v1025_v54 = vpop.f32.mrf.mxu1 }
 0x2d8   : > { %810 = vst.msk [vmem:[%s1367_s27 + $0x68] sm:$0xff] %vm796_vm1, %v1025_v54 }
 0x2d9   : > { %v777_v55 = vpop.f32.mrf.mxu1 }
 0x2da   : > { %809 = vst.msk [vmem:[%s1367_s27 + $0x60] sm:$0xff] %vm796_vm1, %v777_v55 }
 0x2db   : > { %v1010_v56 = vpop.f32.mrf.mxu0 }
 0x2dc   : > { %800 = vst.msk [vmem:[%s1367_s27 + $0x18] sm:$0xff] %vm796_vm1, %v1010_v56 }
 0x2dd   : > { %v727_v57 = vpop.f32.mrf.mxu0 }
 0x2de   : > { %799 = vst.msk [vmem:[%s1367_s27 + $0x10] sm:$0xff] %vm796_vm1, %v727_v57 }
 0x2df   : > { %v1028_v58 = vpop.f32.mrf.mxu1 }
 0x2e0   : > { %812 = vst.msk [vmem:[%s1367_s27 + $0x78] sm:$0xff] %vm796_vm1, %v1028_v58 }
 0x2e1   : > { %v787_v59 = vpop.f32.mrf.mxu1 }
 0x2e2   : > { %811 = vst.msk [vmem:[%s1367_s27 + $0x70] sm:$0xff] %vm796_vm1, %v787_v59 }
 0x2e3   : > { %1163 = shalt.err (!%p1160_p3)
}
 0x2e4   : > { %s1164_s10 = scalar_lea.hbm %s1402_s5, 2048  ;;  %s1168_s19 = scalar_lea.hbm %s1455_s3, 4096 }
 0x2e5   : > { %p1165_p2 = scmp.ne.s32.totalorder %s1402_s5, %s1164_s10  ;;  %p1169_p7 = scmp.lt.s32.totalorder %s1402_s5, %s1455_s3 }
 0x2e6   : > { %p1170_p6 = scmp.lt.s32.totalorder %s1168_s19, %s1164_s10 }
 0x2e7   : > { %p1166_p4 = pnand %p1165_p2, %p1285_p5 }
 0x2e8   : > { %p1171_p9 = por %p1170_p6, %p1169_p7 }
 0x2e9   : > { %p1167_p13 = pneg %p1166_p4 }
 0x2eb   : > { %p1172_p10 = pnand %p1171_p9, %p1167_p13 }
 0x2ed   : > { %1175 = shalt.err (!%p1172_p10)
}
 0x2ee   : > { %s1225_s25 = smov 128   ;;  %s1226_s26 = smov 8  }
 0x2ef   : > { %1041 = dma.vmem_to_hbm [thread:$0]  (%p1285_p5), %s1404_s29, 2048, %s1402_s5, %s1412_s16, %s1225_s25, %s1225_s25, %s1226_s26  }
 0x2f0 PF: > { %p1058_p12 = scmp.ge.s32.totalorder %s1218_s15, 2  ;;  %s843_s27 = sand.u32 1, %s1206_s12  }
 0x2f1   : > { %p1465_p8 = scmp.ne.s32.totalorder %s1458_s23, 0  ;;  %s844_s28 = scalar_lea.sflag [#allocation4], %s843_s27 }
 0x2f3   : > { %p1051_p11 = pnand %p1058_p12, %p1465_p8 }
 0x2f5   : > { %p1052_p0 = pneg %p1051_p11 }
 0x2f7   : > { %1201 = dma.done.wait (%p1052_p0), %s844_s28, 2048  }
 0x2f8   : > { %1203 = vsyncadd (%p1052_p0), %s844_s28, 4294965248  ;;  %p15_p1 = scmp.ge.s32.totalorder %s1272_s18, 4   ;;  %s1466_s12 = smov %s1210_s13 }
 0x2f9   : > { %s1467_s13 = smov %s1214_s14  ;;  %s1468_s14 = smov %s1283_s21 }
 0x2fa   : > { %s1469_s15 = smov %s1272_s18  ;;  %17 = sbr.rel (!%p15_p1) target bundleno = 5 (0x5), region = 76 }
 0x2ff   :  { %849 = vsyncpa [#allocation3], 1 }
 0x300   :  { %851 = vsyncpa [#allocation3 + $0x1], 1 }
 0x301   :  { %852 = vsyncpa [#allocation6], 1 }
 0x302   :  { %853 = vsyncpa [#allocation4], 1 }
 0x303   :  { %855 = vsyncpa [#allocation4 + $0x1], 1 }

</bundles_post_ra>
